<compile_context>
chip_gen: v7x
topology: tpu7x:2x2x1
jax: 0.10.0
libtpu: 0.0.40
codegen_flags: <defaults>
</compile_context>

<pallas_src>
import jax
import jax.numpy as jnp
from jax.experimental import pallas as pl
from jax.experimental.pallas import tpu as pltpu  # noqa: F401  (TPU backend)


# ----------------------------------------------------------------------------
# Kernel 1: hoisted gate-input projections (lane-dense big matmuls, done once)
#   xg_f = X @ W_ih_f + b_f          (S*B, 4H)
#   xg_b = X @ W_ih_b + b_b          (S*B, 4H)
#   yg   = Y @ W_dec_ih[:E] + b_dec  (Td*B, 4H)
# ----------------------------------------------------------------------------
def gate_proj_kernel(x2d_ref, y2d_ref,
                     wih_f_ref, bf_ref, wih_b_ref, bb_ref,
                     wdy_ref, bd_ref,
                     xgf_ref, xgb_ref, yg_ref):
    f32 = jnp.float32
    x2d = x2d_ref[...]
    xgf_ref[...] = (jnp.dot(x2d, wih_f_ref[...], preferred_element_type=f32)
                    + bf_ref[...])
    xgb_ref[...] = (jnp.dot(x2d, wih_b_ref[...], preferred_element_type=f32)
                    + bb_ref[...])
    yg_ref[...] = (jnp.dot(y2d_ref[...], wdy_ref[...], preferred_element_type=f32)
                   + bd_ref[...])


# ----------------------------------------------------------------------------
# Kernel 2: fused forward core — bi-LSTM encoder recurrence, decoder init
# projections, attention projection, decoder LSTMCell + Luong attention +
# combined-output projection, vocab log-softmax scores. Single invocation,
# fully unrolled (S, Td are small and static).
# ----------------------------------------------------------------------------
def nmt_core_kernel(xgf_ref, xgb_ref, yg_ref, valid_ref, ids_ref, tmask_ref,
                    whh_f_ref, whh_b_ref, whp_ref, wcp_ref, watt_ref,
                    wdeco_ref, wdhh_ref, wcomb_ref, wvoc_ref,
                    scores_ref):
    S, B, _ = xgf_ref.shape
    Td = yg_ref.shape[0]
    H = whh_f_ref.shape[0]
    V = wvoc_ref.shape[1]
    f32 = jnp.float32

    def lstm_cell(g, c):
        # gate order (i, f, g, o) along the 4H axis, like PyTorch
        i = jax.nn.sigmoid(g[:, 0:H])
        f = jax.nn.sigmoid(g[:, H:2 * H])
        gg = jnp.tanh(g[:, 2 * H:3 * H])
        o = jax.nn.sigmoid(g[:, 3 * H:4 * H])
        c_new = f * c + i * gg
        h_new = o * jnp.tanh(c_new)
        return h_new, c_new

    valid = valid_ref[...]                     # (S, B, 1) : 1.0 = real token
    whh_f = whh_f_ref[...]
    whh_b = whh_b_ref[...]

    # ---------------- forward encoder direction ----------------
    h = jnp.zeros((B, H), f32)
    c = jnp.zeros((B, H), f32)
    outf = []
    for t in range(S):
        m = valid[t]                                           # (B, 1)
        g = xgf_ref[t] + jnp.dot(h, whh_f, preferred_element_type=f32)
        h_new, c_new = lstm_cell(g, c)
        h = m * h_new + (1.0 - m) * h                          # freeze on pad
        c = m * c_new + (1.0 - m) * c
        outf.append(h * m)                                     # pad -> zeros
    hN_f, cN_f = h, c

    # ---------------- backward encoder direction ----------------
    h = jnp.zeros((B, H), f32)
    c = jnp.zeros((B, H), f32)
    outb = [None] * S
    for j in range(S):
        t = S - 1 - j
        m = valid[t]
        g = xgb_ref[t] + jnp.dot(h, whh_b, preferred_element_type=f32)
        h_new, c_new = lstm_cell(g, c)
        h = m * h_new + (1.0 - m) * h
        c = m * c_new + (1.0 - m) * c
        outb[t] = h * m
    hN_b, cN_b = h, c

    # ---------------- decoder init state (concat-free split matmuls) --------
    whp = whp_ref[...]
    wcp = wcp_ref[...]
    h_dec = (jnp.dot(hN_f, whp[0:H], preferred_element_type=f32)
             + jnp.dot(hN_b, whp[H:2 * H], preferred_element_type=f32))
    c_dec = (jnp.dot(cN_f, wcp[0:H], preferred_element_type=f32)
             + jnp.dot(cN_b, wcp[H:2 * H], preferred_element_type=f32))

    # ---------------- attention projection of encoder states ----------------
    watt = watt_ref[...]
    watt_f = watt[0:H]
    watt_b = watt[H:2 * H]
    encp = [jnp.dot(outf[t], watt_f, preferred_element_type=f32)
            + jnp.dot(outb[t], watt_b, preferred_element_type=f32)
            for t in range(S)]
    outf3 = jnp.stack(outf, axis=0)            # (S, B, H)
    outb3 = jnp.stack(outb, axis=0)            # (S, B, H)
    encp3 = jnp.stack(encp, axis=0)            # (S, B, H)

    # ---------------- decoder + attention + fused scores ---------------------
    w_o = wdeco_ref[...]                       # (H, 4H)  o_prev half of W_dec_ih
    wdhh = wdhh_ref[...]
    wcomb = wcomb_ref[...]
    wc_af = wcomb[0:H]                         # a_t (fwd half)
    wc_ab = wcomb[H:2 * H]                     # a_t (bwd half)
    wc_h = wcomb[2 * H:3 * H]                  # dec hidden part
    wvoc = wvoc_ref[...]
    ids = ids_ref[...]                         # (Td, B, 1) int32 gold ids
    tmask = tmask_ref[...]                     # (Td, B, 1) f32 target mask
    col = jax.lax.broadcasted_iota(jnp.int32, (B, V), 1)

    o_prev = jnp.zeros((B, H), f32)
    score = jnp.zeros((B, 1), f32)
    for t in range(Td):
        # LSTMCell with concat-free input: [y_t, o_prev] @ W = y@Wy + o@Wo
        g = (yg_ref[t]
             + jnp.dot(o_prev, w_o, preferred_element_type=f32)
             + jnp.dot(h_dec, wdhh, preferred_element_type=f32))
        h_dec, c_dec = lstm_cell(g, c_dec)

        # Luong attention, time-major (VPU broadcast-multiply + reductions)
        e = jnp.sum(h_dec[None, :, :] * encp3, axis=-1, keepdims=True)  # (S,B,1)
        e = jnp.where(valid > 0.5, e, -1e30)   # finite mask (no -inf NaNs)
        emax = jnp.max(e, axis=0, keepdims=True)
        p = jnp.exp(e - emax)
        alpha = p / jnp.sum(p, axis=0, keepdims=True)                   # (S,B,1)
        a_f = jnp.sum(alpha * outf3, axis=0)                            # (B, H)
        a_b = jnp.sum(alpha * outb3, axis=0)                            # (B, H)

        # combined-output projection (concat-free) + tanh
        O_t = jnp.tanh(jnp.dot(a_f, wc_af, preferred_element_type=f32)
                       + jnp.dot(a_b, wc_ab, preferred_element_type=f32)
                       + jnp.dot(h_dec, wc_h, preferred_element_type=f32))
        # TODO(synk): dropout on O_t omitted (inference-mode identity)
        o_prev = O_t

        # fused scores: vocab projection + log-softmax + gold gather + mask
        logits = jnp.dot(O_t, wvoc, preferred_element_type=f32)          # (B, V)
        lmax = jnp.max(logits, axis=1, keepdims=True)
        lse = lmax + jnp.log(jnp.sum(jnp.exp(logits - lmax), axis=1,
                                     keepdims=True))
        gold = jnp.sum(jnp.where(col == ids[t], logits, 0.0),
                       axis=1, keepdims=True)                            # (B, 1)
        score = score + (gold - lse) * tmask[t]

    scores_ref[...] = score                    # single lane store at the end


# ----------------------------------------------------------------------------
# Full forward pass (embedding gathers + host-side reshapes in plain JAX,
# everything hot in the two Pallas kernels above)
# ----------------------------------------------------------------------------
def nmt_forward(params, source_padded, source_lengths, target_padded):
    """source_padded: (S, B) int32, target_padded: (T, B) int32 -> scores (B,)."""
    S, B = source_padded.shape
    T = target_padded.shape[0]
    Td = T - 1
    E = params['emb_src'].shape[1]
    H = params['w_hh_f'].shape[0]
    lengths = jnp.asarray(source_lengths, dtype=jnp.int32)

    X = params['emb_src'][source_padded]                        # (S, B, E)
    Y = params['emb_tgt'][target_padded[:-1]]                   # (Td, B, E)
    valid = (jnp.arange(S)[:, None] < lengths[None, :]).astype(jnp.float32)
    valid3 = valid[:, :, None]                                  # (S, B, 1)

    # decoder input weight split (host-side, zero cost)
    w_dec_y = params['w_dec_ih'][:E]                            # (E, 4H)
    w_dec_o = params['w_dec_ih'][E:]                            # (H, 4H)

    # --- kernel 1: hoisted gate-input projections (big lane-dense matmuls) ---
    xgf2, xgb2, yg2 = pl.pallas_call(
        gate_proj_kernel,
        out_shape=(jax.ShapeDtypeStruct((S * B, 4 * H), jnp.float32),
                   jax.ShapeDtypeStruct((S * B, 4 * H), jnp.float32),
                   jax.ShapeDtypeStruct((Td * B, 4 * H), jnp.float32)),
    )(X.reshape(S * B, E), Y.reshape(Td * B, E),
      params['w_ih_f'], params['b_f'], params['w_ih_b'], params['b_b'],
      w_dec_y, params['b_dec'])

    xgf = xgf2.reshape(S, B, 4 * H)
    xgb = xgb2.reshape(S, B, 4 * H)
    yg = yg2.reshape(Td, B, 4 * H)

    tgt_gold = target_padded[1:]
    tgt_ids = tgt_gold[:, :, None].astype(jnp.int32)            # (Td, B, 1)
    tgt_mask = (tgt_gold != 0).astype(jnp.float32)[:, :, None]  # (Td, B, 1)

    # --- kernel 2: fused encoder/decoder/attention/scores --------------------
    scores = pl.pallas_call(
        nmt_core_kernel,
        out_shape=jax.ShapeDtypeStruct((B, 1), jnp.float32),
    )(xgf, xgb, yg, valid3, tgt_ids, tgt_mask,
      params['w_hh_f'], params['w_hh_b'],
      params['w_hproj'], params['w_cproj'], params['w_att'],
      w_dec_o, params['w_dec_hh'], params['w_comb'], params['w_vocab'])

    return scores[:, 0]


# ----------------------------------------------------------------------------
# Pure-JAX reference (mirrors the PyTorch forward exactly) for verification
# ----------------------------------------------------------------------------
def ref_forward(params, source_padded, source_lengths, target_padded):
    sig = jax.nn.sigmoid
    H = params['w_hh_f'].shape[0]
    X = params['emb_src'][source_padded]
    S, B, _ = X.shape
    lengths = jnp.asarray(source_lengths)
    valid = (jnp.arange(S)[:, None] < lengths[None, :]).astype(jnp.float32)

    def run_dir(Xd, vd, wih, whh, b):
        h = jnp.zeros((B, H)); c = jnp.zeros((B, H)); outs = []
        for t in range(Xd.shape[0]):
            m = vd[t][:, None]
            g = Xd[t] @ wih + h @ whh + b
            i = sig(g[:, :H]); f = sig(g[:, H:2 * H])
            gg = jnp.tanh(g[:, 2 * H:3 * H]); o = sig(g[:, 3 * H:])
            c_new = f * c + i * gg; h_new = o * jnp.tanh(c_new)
            h = m * h_new + (1 - m) * h; c = m * c_new + (1 - m) * c
            outs.append(h * m)
        return jnp.stack(outs), h, c

    out_f, hf, cf = run_dir(X, valid, params['w_ih_f'], params['w_hh_f'], params['b_f'])
    out_b_rev, hb, cb = run_dir(X[::-1], valid[::-1], params['w_ih_b'],
                                params['w_hh_b'], params['b_b'])
    out_b = out_b_rev[::-1]
    enc_h = jnp.transpose(jnp.concatenate([out_f, out_b], -1), (1, 0, 2))
    init_h = jnp.concatenate([hf, hb], 1) @ params['w_hproj']
    init_c = jnp.concatenate([cf, cb], 1) @ params['w_cproj']
    enc_masks = 1.0 - valid.T
    enc_proj = enc_h @ params['w_att']
    Y = params['emb_tgt'][target_padded[:-1]]
    h, c = init_h, init_c
    o_prev = jnp.zeros((B, H))
    combined = []
    for t in range(Y.shape[0]):
        ybar = jnp.concatenate([Y[t], o_prev], 1)
        g = ybar @ params['w_dec_ih'] + h @ params['w_dec_hh'] + params['b_dec']
        i = sig(g[:, :H]); f = sig(g[:, H:2 * H])
        gg = jnp.tanh(g[:, 2 * H:3 * H]); o = sig(g[:, 3 * H:])
        c = f * c + i * gg; h = o * jnp.tanh(c)
        e_t = jnp.einsum('bh,bsh->bs', h, enc_proj)
        e_t = jnp.where(enc_masks > 0.5, -jnp.inf, e_t)
        alpha = jax.nn.softmax(e_t, axis=1)
        a_t = jnp.einsum('bs,bsh->bh', alpha, enc_h)
        O_t = jnp.tanh(jnp.concatenate([a_t, h], 1) @ params['w_comb'])
        combined.append(O_t); o_prev = O_t
    combined = jnp.stack(combined)
    logits = combined @ params['w_vocab']
    P = jax.nn.log_softmax(logits, -1)
    tgt = target_padded[1:]
    gold = jnp.take_along_axis(P, tgt[:, :, None], axis=-1)[..., 0]
    tmask = (tgt != 0).astype(jnp.float32)
    return (gold * tmask).sum(0)


# ----------------------------------------------------------------------------
if __name__ == "__main__":
    B, S, T = 4, 8, 7             # batch, max src len, max tgt len (incl <s>/</s>)
    E, H = 16, 32                 # embed size, hidden size
    VS, VT = 48, 40               # src / tgt vocab sizes (pad=0, <s>=1, </s>=2)
    source_lengths = [8, 7, 5, 3]     # sorted longest -> shortest
    target_lengths = [7, 6, 5, 4]

    key = jax.random.PRNGKey(0)
    ks = iter(jax.random.split(key, 32))

    def w(k, shape, scale=0.1):
        return (scale * jax.random.normal(k, shape)).astype(jnp.float32)

    emb_src = w(next(ks), (VS, E)).at[0].set(0.0)   # padding_idx=0
    emb_tgt = w(next(ks), (VT, E)).at[0].set(0.0)
    params = dict(
        emb_src=emb_src, emb_tgt=emb_tgt,
        # encoder bi-LSTM (fwd / bwd); bias = b_ih + b_hh merged
        w_ih_f=w(next(ks), (E, 4 * H)), w_hh_f=w(next(ks), (H, 4 * H)), b_f=w(next(ks), (1, 4 * H)),
        w_ih_b=w(next(ks), (E, 4 * H)), w_hh_b=w(next(ks), (H, 4 * H)), b_b=w(next(ks), (1, 4 * H)),
        # projections (stored as (in, out))
        w_hproj=w(next(ks), (2 * H, H)), w_cproj=w(next(ks), (2 * H, H)),
        w_att=w(next(ks), (2 * H, H)),
        # decoder LSTMCell(e + h, h)
        w_dec_ih=w(next(ks), (E + H, 4 * H)), w_dec_hh=w(next(ks), (H, 4 * H)),
        b_dec=w(next(ks), (1, 4 * H)),
        w_comb=w(next(ks), (3 * H, H)),
        w_vocab=w(next(ks), (H, VT)),
    )

    # source_padded (S, B): random word ids, 0 beyond length
    src_ids = jax.random.randint(next(ks), (S, B), 3, VS, dtype=jnp.int32)
    spos = jnp.arange(S)[:, None]
    slens = jnp.asarray(source_lengths)
    source_padded = jnp.where(spos < slens[None, :], src_ids, 0).astype(jnp.int32)

    # target_padded (T, B): <s> words </s> pad...
    tgt_words = jax.random.randint(next(ks), (T, B), 3, VT, dtype=jnp.int32)
    tpos = jnp.arange(T)[:, None]
    tlens = jnp.asarray(target_lengths)
    target_padded = jnp.where(
        tpos == 0, 1,
        jnp.where(tpos == tlens[None, :] - 1, 2,
                  jnp.where(tpos < tlens[None, :] - 1, tgt_words, 0))).astype(jnp.int32)

    scores = nmt_forward(params, source_padded, source_lengths, target_padded)
    scores = jax.block_until_ready(scores)

    ref = ref_forward(params, source_padded, source_lengths, target_padded)
    assert scores.shape == (B,)
    assert jnp.allclose(scores, ref, rtol=2e-3, atol=2e-2), (scores, ref)
    print("KERNEL_OK")
</pallas_src>

<mosaic_0001>
module attributes {stable_mosaic.version = 11 : i64} {
  func.func @gate_proj_kernel(%arg0: memref<32x16xf32, #tpu.memory_space<vmem>>, %arg1: memref<24x16xf32, #tpu.memory_space<vmem>>, %arg2: memref<16x128xf32, #tpu.memory_space<vmem>>, %arg3: memref<1x128xf32, #tpu.memory_space<vmem>>, %arg4: memref<16x128xf32, #tpu.memory_space<vmem>>, %arg5: memref<1x128xf32, #tpu.memory_space<vmem>>, %arg6: memref<16x128xf32, #tpu.memory_space<vmem>>, %arg7: memref<1x128xf32, #tpu.memory_space<vmem>>, %arg8: memref<32x128xf32, #tpu.memory_space<vmem>>, %arg9: memref<32x128xf32, #tpu.memory_space<vmem>>, %arg10: memref<24x128xf32, #tpu.memory_space<vmem>>) attributes {dimension_semantics = [], scalar_prefetch = 0 : i64, scratch_operands = 0 : i64, tpu.core_type = #tpu.core_type<tc>} {
    %c0 = arith.constant 0 : index
    %c0_0 = arith.constant 0 : index
    %0 = vector.load %arg0[%c0, %c0_0] : memref<32x16xf32, #tpu.memory_space<vmem>>, vector<32x16xf32>
    %c0_1 = arith.constant 0 : index
    %c0_2 = arith.constant 0 : index
    %1 = vector.load %arg2[%c0_1, %c0_2] : memref<16x128xf32, #tpu.memory_space<vmem>>, vector<16x128xf32>
    %cst = arith.constant dense<0.000000e+00> : vector<32x128xf32>
    %2 = tpu.matmul %0, %1, %cst {dimension_numbers = #tpu.dot_dimension_numbers<[1], [0], [0], [1], [0, 0, 1, 1], [], []>} : vector<32x16xf32>, vector<16x128xf32>, vector<32x128xf32> -> vector<32x128xf32>
    %c0_3 = arith.constant 0 : index
    %c0_4 = arith.constant 0 : index
    %3 = vector.load %arg3[%c0_3, %c0_4] : memref<1x128xf32, #tpu.memory_space<vmem>>, vector<1x128xf32>
    %4 = vector.broadcast %3 : vector<1x128xf32> to vector<32x128xf32>
    %5 = arith.addf %2, %4 : vector<32x128xf32>
    %c0_5 = arith.constant 0 : index
    %c0_6 = arith.constant 0 : index
    %6 = vector.load %arg8[%c0_5, %c0_6] : memref<32x128xf32, #tpu.memory_space<vmem>>, vector<32x128xf32>
    tpu.vector_store %arg8[%c0_5, %c0_6], %5 {strides = array<i32>} : memref<32x128xf32, #tpu.memory_space<vmem>>, vector<32x128xf32>,
    %c0_7 = arith.constant 0 : index
    %c0_8 = arith.constant 0 : index
    %7 = vector.load %arg4[%c0_7, %c0_8] : memref<16x128xf32, #tpu.memory_space<vmem>>, vector<16x128xf32>
    %cst_9 = arith.constant dense<0.000000e+00> : vector<32x128xf32>
    %8 = tpu.matmul %0, %7, %cst_9 {dimension_numbers = #tpu.dot_dimension_numbers<[1], [0], [0], [1], [0, 0, 1, 1], [], []>} : vector<32x16xf32>, vector<16x128xf32>, vector<32x128xf32> -> vector<32x128xf32>
    %c0_10 = arith.constant 0 : index
    %c0_11 = arith.constant 0 : index
    %9 = vector.load %arg5[%c0_10, %c0_11] : memref<1x128xf32, #tpu.memory_space<vmem>>, vector<1x128xf32>
    %10 = vector.broadcast %9 : vector<1x128xf32> to vector<32x128xf32>
    %11 = arith.addf %8, %10 : vector<32x128xf32>
    %c0_12 = arith.constant 0 : index
    %c0_13 = arith.constant 0 : index
    %12 = vector.load %arg9[%c0_12, %c0_13] : memref<32x128xf32, #tpu.memory_space<vmem>>, vector<32x128xf32>
    tpu.vector_store %arg9[%c0_12, %c0_13], %11 {strides = array<i32>} : memref<32x128xf32, #tpu.memory_space<vmem>>, vector<32x128xf32>,
    %c0_14 = arith.constant 0 : index
    %c0_15 = arith.constant 0 : index
    %13 = vector.load %arg1[%c0_14, %c0_15] : memref<24x16xf32, #tpu.memory_space<vmem>>, vector<24x16xf32>
    %c0_16 = arith.constant 0 : index
    %c0_17 = arith.constant 0 : index
    %14 = vector.load %arg6[%c0_16, %c0_17] : memref<16x128xf32, #tpu.memory_space<vmem>>, vector<16x128xf32>
    %cst_18 = arith.constant dense<0.000000e+00> : vector<24x128xf32>
    %15 = tpu.matmul %13, %14, %cst_18 {dimension_numbers = #tpu.dot_dimension_numbers<[1], [0], [0], [1], [0, 0, 1, 1], [], []>} : vector<24x16xf32>, vector<16x128xf32>, vector<24x128xf32> -> vector<24x128xf32>
    %c0_19 = arith.constant 0 : index
    %c0_20 = arith.constant 0 : index
    %16 = vector.load %arg7[%c0_19, %c0_20] : memref<1x128xf32, #tpu.memory_space<vmem>>, vector<1x128xf32>
    %17 = vector.broadcast %16 : vector<1x128xf32> to vector<24x128xf32>
    %18 = arith.addf %15, %17 : vector<24x128xf32>
    %c0_21 = arith.constant 0 : index
    %c0_22 = arith.constant 0 : index
    %19 = vector.load %arg10[%c0_21, %c0_22] : memref<24x128xf32, #tpu.memory_space<vmem>>, vector<24x128xf32>
    tpu.vector_store %arg10[%c0_21, %c0_22], %18 {strides = array<i32>} : memref<24x128xf32, #tpu.memory_space<vmem>>, vector<24x128xf32>,
    return
  }
}

</mosaic_0001>

<bundles_post_ra>
// kernel: tpu_custom_call.1
= control target key start
LH: loop header
LB: loop body
LE: loop exit
PB: predicated region body
PF: predicated region fallthrough
CT: control target
= control target key end

     0   :  { %16 = vsyncpa [#allocation3], 0  ;;  %vm47_vm0 = vcmask 130048   ;;  %v551_v6 = vmov 0.0|0.0   ;;  %vm552_vm1 = vmmov 0   ;;  %v553_v10 = vmov 0.0   ;;  %s728_s0 = inlined_call_operand.vmem [shape: f32[32,16], index: 0, kind: input, shape index: {}]   ;;  %s729_s1 = inlined_call_operand.vmem [shape: f32[24,16], index: 1, kind: input, shape index: {}]   ;;  %s730_s2 = inlined_call_operand.vmem [shape: f32[16,128], index: 2, kind: input, shape index: {}]   ;;  %s731_s3 = inlined_call_operand.vmem [shape: f32[1,128], index: 3, kind: input, shape index: {}]   ;;  %s732_s4 = inlined_call_operand.vmem [shape: f32[16,128], index: 4, kind: input, shape index: {}]   ;;  %s733_s5 = inlined_call_operand.vmem [shape: f32[1,128], index: 5, kind: input, shape index: {}]   ;;  %s734_s6 = inlined_call_operand.vmem [shape: f32[16,128], index: 6, kind: input, shape index: {}]   ;;  %s735_s7 = inlined_call_operand.vmem [shape: f32[1,128], index: 7, kind: input, shape index: {}]   ;;  %s736_s8 = inlined_call_operand.hbm [shape: f32[32,128], index: 8, kind: output, shape index: {0}]   ;;  %s737_s9 = inlined_call_operand.hbm [shape: f32[32,128], index: 9, kind: output, shape index: {1}]   ;;  %s738_s10 = inlined_call_operand.hbm [shape: f32[24,128], index: 10, kind: output, shape index: {2}]  }
   0x1   :  { %v38_v0 = vld [vmem:[%s730_s2] sm:$0xff]  ;;  %v39_v1 = vld [vmem:[%s730_s2 + $0x8] sm:$0xff]  ;;  %470 = vmatprep.subr.bf16.mxu0 %v551_v6  ;;  %453 = vmatprep.mubr.msk.f32.mxu0 %vm552_vm1, %v553_v10 }
   0x2   :  { %v34_v2 = vld [vmem:[%s728_s0] sm:$0xff]  ;;  %v462_v3 = vpack.c.bf16 %v39_v1, %v38_v0  ;;  %v150_v5 = vld [vmem:[%s732_s4 + $0x8] sm:$0xff] }
   0x3   :  { %433 = vmatprep.mubr.msk.f32.mxu1 %vm47_vm0, %v34_v2  ;;  %v149_v4 = vld [vmem:[%s732_s4] sm:$0xff]  ;;  %v251_v9 = vld [vmem:[%s734_s6 + $0x8] sm:$0xff] }
   0x4   :  { %v466_v7 = vpack.c.bf16 %v150_v5, %v149_v4  ;;  %v250_v8 = vld [vmem:[%s734_s6] sm:$0xff]  ;;  %463 = vmatprep.subr.bf16.mxu1 %v462_v3  ;;  %v35_v12 = vld [vmem:[%s728_s0 + $0x8] sm:$0xff] }
   0x5   :  { %v471_v11 = vpack.c.bf16 %v251_v9, %v250_v8  ;;  %465 = vmatpush3.bf16.msra.mxu1 %v462_v3 }
   0x6   :  { %17 = vsyncpa [#allocation5], 0  ;;  %467 = vmatprep.subr.bf16.mxu1 %v466_v7  ;;  %v36_v13 = vld [vmem:[%s728_s0 + $0x10] sm:$0xff]  ;;  %v247_v14 = vld [vmem:[%s729_s1] sm:$0xff] }
   0x7   :  { %472 = vmatpush3.bf16.msra.mxu0 %v471_v11  ;;  %v37_v15 = vld [vmem:[%s728_s0 + $0x18] sm:$0xff]  ;;  %v248_v16 = vld [vmem:[%s729_s1 + $0x8] sm:$0xff]  ;;  %v249_v17 = vld [vmem:[%s729_s1 + $0x10] sm:$0xff]  ;;  %s554_s1 = smov [#allocation2]  }
   0x8   :  { %434 = vmatmul.mubr.msk.f32.vlgmr.msra.gmra.mrb[0].mxu1 %vm47_vm0, %v35_v12  ;;  %v398_v18 = vld [vmem:[%s731_s3] ss:$0 sm:$0xff]  ;;  %s356_s19 = sshll.u32 %s554_s1, 4  ;;  %s357_s19 = int_to_ptr.vmem [resolvable:$true] %s356_s19 }
   0x9   :  { %469 = vmatpush3.bf16.msra.mxu1 %v466_v7  ;;  %436 = vmatprep.mubr.msk.f32.mxu1 %vm47_vm0, %v36_v13  ;;  %v408_v20 = vld [vmem:[%s735_s7] ss:$0 sm:$0xff]  ;;  %s481_s7 = scalar_lea.vmem %s357_s19, 512  ;;  %p486_p1 = scmp.lt.s32.totalorder %s357_s19, %s357_s19 }
   0xa   :  { %454 = vmatmul.mubr.msk.f32.vlgmr.msra.gmra.mrb[0].mxu0 %vm47_vm0, %v247_v14  ;;  %v403_v31 = vld [vmem:[%s733_s5] ss:$0 sm:$0xff]  ;;  %p482_p0 = scmp.ne.s32.totalorder %s357_s19, %s481_s7  ;;  %p487_p2 = scmp.lt.s32.totalorder %s481_s7, %s481_s7 }
   0xb   :  { %456 = vmatprep.mubr.msk.f32.mxu0 %vm552_vm1, %v553_v10 }
   0xc   :  { %437 = vmatmul.mubr.msk.f32.gmra.mrb[2].mxu1 %vm47_vm0, %v37_v15  ;;  %p488_p3 = por %p487_p2, %p486_p1 }
   0xd   :  { %443 = vmatprep.mubr.msk.f32.mxu1 %vm47_vm0, %v34_v2 }
   0xe   :  { %457 = vmatmul.mubr.msk.f32.gmra.mrb[2].mxu0 %vm47_vm0, %v248_v16  ;;  %p489_p4 = pnand %p488_p3, %p482_p0 }
   0xf   :  { %459 = vmatprep.mubr.msk.f32.mxu0 %vm552_vm1, %v553_v10 }
  0x10   :  { %444 = vmatmul.mubr.msk.f32.vlgmr.msra.gmra.mrb[4].mxu1 %vm47_vm0, %v35_v12 }
  0x11   :  { %446 = vmatprep.mubr.msk.f32.mxu1 %vm47_vm0, %v36_v13 }
  0x12   :  { %460 = vmatmul.mubr.msk.f32.gmra.mrb[4].mxu0 %vm47_vm0, %v249_v17 }
  0x14   :  { %447 = vmatmul.mubr.msk.f32.gmra.mrb[6].mxu1 %vm47_vm0, %v37_v15 }
  0xdb   :  { %v435_v19 = vpop.f32.mrb[0].mxu1 }
  0xdc   :  { %v132_v21 = vadd.f32 %v435_v19, %v398_v18  ;;  %v126_v22 = vpop.f32.mrb[1].mxu1 }
  0xdd   :  { %v127_v23 = vadd.f32 %v398_v18, %v126_v22  ;;  %v334_v24 = vpop.f32.mrb[0].mxu0 }
  0xde   :  { %146 = vst [vmem:[#allocation2 + $0x8] sm:$0xff] %v132_v21  ;;  %v335_v25 = vadd.f32 %v408_v20, %v334_v24  ;;  %v455_v26 = vpop.f32.mrb[1].mxu0 }
  0xdf   :  { %145 = vst [vmem:[#allocation2] sm:$0xff] %v127_v23  ;;  %v438_v27 = vpop.f32.mrb[2].mxu1 }
  0xe0   :  { %v142_v28 = vadd.f32 %v438_v27, %v398_v18  ;;  %v136_v29 = vpop.f32.mrb[3].mxu1  ;;  %348 = vst [vmem:[#allocation6] sm:$0xff] %v335_v25 }
  0xe1   :  { %v137_v30 = vadd.f32 %v398_v18, %v136_v29  ;;  %v339_v32 = vpop.f32.mrb[2].mxu0 }
  0xe2   :  { %148 = vst [vmem:[#allocation2 + $0x18] sm:$0xff] %v142_v28  ;;  %v340_v33 = vadd.f32 %v408_v20, %v339_v32  ;;  %v458_v34 = vpop.f32.mrb[3].mxu0 }
  0xe3   :  { %147 = vst [vmem:[#allocation2 + $0x10] sm:$0xff] %v137_v30  ;;  %v445_v35 = vpop.f32.mrb[4].mxu1 }
  0xe4   :  { %v230_v36 = vadd.f32 %v445_v35, %v403_v31  ;;  %v224_v37 = vpop.f32.mrb[5].mxu1  ;;  %349 = vst [vmem:[#allocation6 + $0x8] sm:$0xff] %v340_v33 }
  0xe5   :  { %492 = shalt.err (!%p489_p4)
}
  0xe6   :  { %s493_s5 = scalar_lea.hbm %s736_s8, 512 }
  0xe7   :  { %p494_p5 = scmp.ne.s32.totalorder %s736_s8, %s493_s5  ;;  %p497_p6 = scmp.lt.u32.totalorder %s493_s5, %s736_s8 }
  0xe9   :  { %p499_p7 = pnand %p497_p6, %p494_p5 }
  0xeb   :  { %502 = shalt.err (!%p499_p7)
}
  0xec   :  { %s555_s26 = smov 128   ;;  %s556_s4 = smov 8   ;;  %v225_v38 = vadd.f32 %v403_v31, %v224_v37  ;;  %v344_v39 = vpop.f32.mrb[4].mxu0  ;;  %244 = vst [vmem:[#allocation4 + $0x8] sm:$0xff] %v230_v36  ;;  %v448_v42 = vpop.f32.mrb[6].mxu1 }
  0xed   :  { %362 = dma.vmem_to_hbm [thread:$0]  %s357_s19, 512, %s736_s8, [#allocation3], %s555_s26, %s555_s26, %s556_s4   ;;  %v345_v40 = vadd.f32 %v408_v20, %v344_v39  ;;  %v461_v41 = vpop.f32.mrb[5].mxu0  ;;  %v240_v43 = vadd.f32 %v448_v42, %v403_v31  ;;  %v234_v44 = vpop.f32.mrb[7].mxu1 }
  0xee   :  { %s557_s29 = smov [#allocation4]   ;;  %243 = vst [vmem:[#allocation4] sm:$0xff] %v225_v38  ;;  %s558_s30 = smov [#allocation6]   ;;  %v235_v45 = vadd.f32 %v403_v31, %v234_v44 }
  0xef   :  { %s368_s6 = sshll.u32 %s557_s29, 4  ;;  %s380_s11 = sshll.u32 %s558_s30, 4  ;;  %350 = vst [vmem:[#allocation6 + $0x10] sm:$0xff] %v345_v40  ;;  %246 = vst [vmem:[#allocation4 + $0x18] sm:$0xff] %v240_v43  ;;  %s369_s6 = int_to_ptr.vmem [resolvable:$true] %s368_s6  ;;  %s691_s11 = int_to_ptr.vmem [resolvable:$true] %s380_s11 }
  0xf0   :  { %245 = vst [vmem:[#allocation4 + $0x10] sm:$0xff] %v235_v45  ;;  %s503_s8 = scalar_lea.vmem %s369_s6, 512  ;;  %p508_p9 = scmp.lt.s32.totalorder %s369_s6, %s369_s6 }
  0xf1   :  { %p504_p8 = scmp.ne.s32.totalorder %s369_s6, %s503_s8  ;;  %p509_p10 = scmp.lt.s32.totalorder %s503_s8, %s503_s8 }
  0xf3   :  { %p510_p11 = por %p509_p10, %p508_p9 }
  0xf5   :  { %p511_p12 = pnand %p510_p11, %p504_p8 }
  0xf7   :  { %514 = shalt.err (!%p511_p12)
}
  0xf8   :  { %s515_s14 = scalar_lea.hbm %s737_s9, 512 }
  0xf9   :  { %p516_p13 = scmp.ne.s32.totalorder %s737_s9, %s515_s14  ;;  %p519_p0 = scmp.lt.u32.totalorder %s515_s14, %s737_s9 }
  0xfb   :  { %p521_p1 = pnand %p519_p0, %p516_p13 }
  0xfd   :  { %524 = shalt.err (!%p521_p1)
}
  0xfe   :  { %374 = dma.vmem_to_hbm [thread:$0]  %s369_s6, 512, %s737_s9, [#allocation5], %s555_s26, %s555_s26, %s556_s4  }
  0xff   :  { %s525_s19 = scalar_lea.vmem %s691_s11, 384  ;;  %p530_p3 = scmp.lt.s32.totalorder %s691_s11, %s691_s11 }
 0x100   :  { %p526_p2 = scmp.ne.s32.totalorder %s691_s11, %s525_s19  ;;  %p531_p4 = scmp.lt.s32.totalorder %s525_s19, %s525_s19 }
 0x102   :  { %p532_p5 = por %p531_p4, %p530_p3 }
 0x104   :  { %p533_p6 = pnand %p532_p5, %p526_p2 }
 0x106   :  { %536 = shalt.err (!%p533_p6)
}
 0x107   :  { %s537_s7 = scalar_lea.hbm %s738_s10, 384 }
 0x108   :  { %p538_p7 = scmp.ne.s32.totalorder %s738_s10, %s537_s7  ;;  %p541_p8 = scmp.lt.u32.totalorder %s537_s7, %s738_s10 }
 0x10a   :  { %p543_p9 = pnand %p541_p8, %p538_p7 }
 0x10c   :  { %546 = shalt.err (!%p543_p9)
}
 0x10d   :  { %386 = dma.vmem_to_hbm [thread:$0]  %s691_s11, 384, %s738_s10, [#allocation5], %s555_s26, %s555_s26, %s556_s4  }
 0x10e   :  { %547 = dma.done.wait [#allocation3], 512  }
 0x10f   :  { %548 = vsyncadd [#allocation3], 4294966784 }
 0x110   :  { %549 = dma.done.wait [#allocation5], 896  }
 0x111   :  { %550 = vsyncadd [#allocation5], 4294966400 }
 0x112   :  { %396 = vsyncpa [#allocation3], 1 }
 0x113   :  { %397 = vsyncpa [#allocation5], 1 }

</bundles_post_ra>
